<compile_context>
chip_gen: v7x
topology: tpu7x:2x2x1
jax: 0.10.0
libtpu: 0.0.40
codegen_flags: <defaults>
</compile_context>

<pallas_src>
import math

import jax
import jax.numpy as jnp
from jax.experimental import pallas as pl
from jax.experimental.pallas import tpu as pltpu


INV_SQRT2 = 1.0 / math.sqrt(2.0)
LANE = 128
SUBLANE = 8
_MIN_SPLIT_ROWS = 2048  # split a single-tile grid into 2 steps once M >= 2 * this


def _round_up(x, m):
    return ((x + m - 1) // m) * m


def _lane_pad(n):
    return max(_round_up(n, LANE), LANE)


def _choose_tm(m, block_m):
    """Pick the per-step row tile.

    - If M exceeds block_m, tile by block_m (multiple of 8) with a masked partial
      last block.
    - If M fits in one tile but there is enough work, split into >=2 grid steps so
      the "parallel" grid axis actually shards across the 2 TensorCores on v7x.
    - Otherwise a single full-extent block (legal regardless of 8-divisibility).
    """
    if m > block_m:
        return block_m
    if m >= 2 * _MIN_SPLIT_ROWS:
        return _round_up(pl.cdiv(m, 2), SUBLANE)
    return m


def _adapter_kernel(x_ref, w1_ref, b1_ref, w2_ref, b2_ref, o_ref):
    # x:  (TM, idim)        w1: (idim, bottleneck)      b1: (1, bottleneck)
    # w2: (bottleneck, N)   b2: (1, N)                  o:  (TM, N)   (N = num_classes)

    # First linear layer (MXU matmul, f32 accumulation) + bias.
    h = jnp.dot(x_ref[...], w1_ref[...], preferred_element_type=jnp.float32)
    h = h + b1_ref[...].astype(jnp.float32)

    # Exact GELU (erf-based), matching torch.nn.GELU() default, kept in f32 so it is
    # valid on v5e (no bf16 VPU/EUP) as well.
    h = 0.5 * h * (1.0 + jax.lax.erf(h * INV_SQRT2))

    # Second linear layer + bias; narrow (num_classes-wide) store — the real HBM
    # bytes, not lane-padded ones.
    y = jnp.dot(h, w2_ref[...], preferred_element_type=jnp.float32)
    y = y + b2_ref[...].astype(jnp.float32)
    o_ref[...] = y.astype(o_ref.dtype)


def language_adapter_forward(x, w1, b1, w2, b2, *, block_m=4096):
    """x: (batch, seq, idim). Returns (batch, seq, num_classes) in x.dtype.

    w1: (idim, bottleneck), b1: (bottleneck,), w2: (bottleneck, num_classes),
    b2: (num_classes,)  — weights stored as (in_features, out_features).
    """
    assert block_m >= SUBLANE and block_m % SUBLANE == 0, "block_m must be a multiple of 8"
    batch, seq, idim = x.shape
    bottleneck, num_classes = w2.shape
    assert w1.shape == (idim, bottleneck)

    M = batch * seq
    out_dtype = x.dtype
    x2d = x.reshape(M, idim)                       # free reshape, no copy/pad pass
    b1_2d = b1.reshape(1, bottleneck)
    b2_2d = b2.reshape(1, num_classes)

    tm = _choose_tm(M, block_m)
    grid = (pl.cdiv(M, tm),)                       # partial last block handled by Pallas

    in_bytes = x2d.dtype.itemsize

    # Per-step VMEM footprint (lane-padded, as allocated in VMEM): double-buffered x
    # and out tiles, the hidden-activation working set, resident weights/biases.
    est = (2 * tm * _lane_pad(idim) * in_bytes
           + 2 * tm * _lane_pad(num_classes) * out_dtype.itemsize
           + tm * _lane_pad(bottleneck) * 4
           + 2 * (idim * _lane_pad(bottleneck)
                  + bottleneck * _lane_pad(num_classes)
                  + _lane_pad(bottleneck) + _lane_pad(num_classes)) * 4)
    vmem_limit = int(min(48 * 1024 * 1024, max(16 * 1024 * 1024, est + (8 << 20))))

    # Honest (unpadded) cost for the XLA scheduler.
    cost = pl.CostEstimate(
        flops=2 * M * idim * bottleneck + 2 * M * bottleneck * num_classes,
        transcendentals=M * bottleneck,
        bytes_accessed=(M * idim * in_bytes
                        + M * num_classes * out_dtype.itemsize
                        + (idim * bottleneck + bottleneck
                           + bottleneck * num_classes + num_classes) * 4),
    )

    out = pl.pallas_call(
        _adapter_kernel,
        out_shape=jax.ShapeDtypeStruct((M, num_classes), out_dtype),
        grid_spec=pltpu.PrefetchScalarGridSpec(
            num_scalar_prefetch=0,
            grid=grid,
            in_specs=[
                pl.BlockSpec((tm, idim), lambda i: (i, 0)),               # x tiles
                pl.BlockSpec((idim, bottleneck), lambda i: (0, 0)),       # w1 (resident)
                pl.BlockSpec((1, bottleneck), lambda i: (0, 0)),          # b1 (resident)
                pl.BlockSpec((bottleneck, num_classes), lambda i: (0, 0)),# w2 (resident)
                pl.BlockSpec((1, num_classes), lambda i: (0, 0)),         # b2 (resident)
            ],
            out_specs=pl.BlockSpec((tm, num_classes), lambda i: (i, 0)),
        ),
        compiler_params=pltpu.CompilerParams(
            dimension_semantics=("parallel",),
            vmem_limit_bytes=vmem_limit,
        ),
        cost_estimate=cost,
    )(x2d, w1, b1_2d, w2, b2_2d)

    return out.reshape(batch, seq, num_classes)


def _init_params(key, idim, bottleneck, num_classes):
    """Deterministic init mimicking PyTorch Linear default (uniform +/- 1/sqrt(fan_in))."""
    k1, k2, k3, k4 = jax.random.split(key, 4)
    lim1 = 1.0 / math.sqrt(idim)
    lim2 = 1.0 / math.sqrt(bottleneck)
    # Stored already transposed: (in_features, out_features), so kernel does x @ W.
    w1 = jax.random.uniform(k1, (idim, bottleneck), jnp.float32, -lim1, lim1)
    b1 = jax.random.uniform(k2, (bottleneck,), jnp.float32, -lim1, lim1)
    w2 = jax.random.uniform(k3, (bottleneck, num_classes), jnp.float32, -lim2, lim2)
    b2 = jax.random.uniform(k4, (num_classes,), jnp.float32, -lim2, lim2)
    return w1, b1, w2, b2


if __name__ == "__main__":
    # Small shapes consistent with the module: idim=32 -> bottleneck=idim//4=8 -> 3 classes.
    batch, seq, idim = 2, 8, 32
    bottleneck = idim // 4
    num_classes = 3

    key = jax.random.PRNGKey(0)
    kx, kp = jax.random.split(key)
    x = jax.random.normal(kx, (batch, seq, idim), jnp.float32)
    w1, b1, w2, b2 = _init_params(kp, idim, bottleneck, num_classes)

    y = language_adapter_forward(x, w1, b1, w2, b2)
    y = jax.block_until_ready(y)

    # Pure-JAX reference check of the same math (f32 path).
    h_ref = x.reshape(-1, idim) @ w1 + b1
    h_ref = 0.5 * h_ref * (1.0 + jax.lax.erf(h_ref * INV_SQRT2))
    y_ref = (h_ref @ w2 + b2).reshape(batch, seq, num_classes)
    assert y.shape == (batch, seq, num_classes)
    assert jnp.allclose(y, y_ref, atol=1e-5, rtol=1e-5), "mismatch vs reference"

    print("KERNEL_OK")
</pallas_src>

<mosaic_0001>
module attributes {stable_mosaic.version = 11 : i64} {
  func.func @_adapter_kernel(%arg0: i32, %arg1: memref<16x32xf32, #tpu.memory_space<vmem>>, %arg2: memref<32x8xf32, #tpu.memory_space<vmem>>, %arg3: memref<1x8xf32, #tpu.memory_space<vmem>>, %arg4: memref<8x3xf32, #tpu.memory_space<vmem>>, %arg5: memref<1x3xf32, #tpu.memory_space<vmem>>, %arg6: memref<16x3xf32, #tpu.memory_space<vmem>>) attributes {dimension_semantics = [#tpu.dimension_semantics<parallel>], iteration_bounds = array<i64: 1>, scalar_prefetch = 0 : i64, scratch_operands = 0 : i64, tpu.core_type = #tpu.core_type<tc>, window_params = [{transform_indices = @transform_0, window_bounds = array<i64: 16, 32>}, {pipeline_mode = #tpu.pipeline_mode<synchronous>, transform_indices = @transform_1, window_bounds = array<i64: 32, 8>}, {pipeline_mode = #tpu.pipeline_mode<synchronous>, transform_indices = @transform_2, window_bounds = array<i64: 1, 8>}, {pipeline_mode = #tpu.pipeline_mode<synchronous>, transform_indices = @transform_3, window_bounds = array<i64: 8, 3>}, {pipeline_mode = #tpu.pipeline_mode<synchronous>, transform_indices = @transform_4, window_bounds = array<i64: 1, 3>}, {transform_indices = @transform_5, window_bounds = array<i64: 16, 3>}]} {
    %c0 = arith.constant 0 : index
    %c0_0 = arith.constant 0 : index
    %0 = vector.load %arg1[%c0, %c0_0] : memref<16x32xf32, #tpu.memory_space<vmem>>, vector<16x32xf32>
    %c0_1 = arith.constant 0 : index
    %c0_2 = arith.constant 0 : index
    %1 = vector.load %arg2[%c0_1, %c0_2] : memref<32x8xf32, #tpu.memory_space<vmem>>, vector<32x8xf32>
    %cst = arith.constant dense<0.000000e+00> : vector<16x8xf32>
    %2 = tpu.matmul %0, %1, %cst {dimension_numbers = #tpu.dot_dimension_numbers<[1], [0], [0], [1], [0, 0, 1, 1], [], []>} : vector<16x32xf32>, vector<32x8xf32>, vector<16x8xf32> -> vector<16x8xf32>
    %c0_3 = arith.constant 0 : index
    %c0_4 = arith.constant 0 : index
    %3 = vector.load %arg3[%c0_3, %c0_4] : memref<1x8xf32, #tpu.memory_space<vmem>>, vector<1x8xf32>
    %4 = vector.broadcast %3 : vector<1x8xf32> to vector<16x8xf32>
    %5 = arith.addf %2, %4 : vector<16x8xf32>
    %cst_5 = arith.constant 5.000000e-01 : f32
    %6 = vector.broadcast %cst_5 : f32 to vector<16x8xf32>
    %7 = arith.mulf %6, %5 : vector<16x8xf32>
    %cst_6 = arith.constant 0.707106769 : f32
    %8 = vector.broadcast %cst_6 : f32 to vector<16x8xf32>
    %9 = arith.mulf %5, %8 : vector<16x8xf32>
    %10 = math.erf %9 : vector<16x8xf32>
    %cst_7 = arith.constant 1.000000e+00 : f32
    %11 = vector.broadcast %cst_7 : f32 to vector<16x8xf32>
    %12 = arith.addf %11, %10 : vector<16x8xf32>
    %13 = arith.mulf %7, %12 : vector<16x8xf32>
    %c0_8 = arith.constant 0 : index
    %c0_9 = arith.constant 0 : index
    %14 = vector.load %arg4[%c0_8, %c0_9] : memref<8x3xf32, #tpu.memory_space<vmem>>, vector<8x3xf32>
    %cst_10 = arith.constant dense<0.000000e+00> : vector<16x3xf32>
    %15 = tpu.matmul %13, %14, %cst_10 {dimension_numbers = #tpu.dot_dimension_numbers<[1], [0], [0], [1], [0, 0, 1, 1], [], []>} : vector<16x8xf32>, vector<8x3xf32>, vector<16x3xf32> -> vector<16x3xf32>
    %c0_11 = arith.constant 0 : index
    %c0_12 = arith.constant 0 : index
    %16 = vector.load %arg5[%c0_11, %c0_12] : memref<1x3xf32, #tpu.memory_space<vmem>>, vector<1x3xf32>
    %17 = vector.broadcast %16 : vector<1x3xf32> to vector<16x3xf32>
    %18 = arith.addf %15, %17 : vector<16x3xf32>
    %c0_13 = arith.constant 0 : index
    %c0_14 = arith.constant 0 : index
    %19 = vector.load %arg6[%c0_13, %c0_14] : memref<16x3xf32, #tpu.memory_space<vmem>>, vector<16x3xf32>
    tpu.vector_store %arg6[%c0_13, %c0_14], %18 {strides = array<i32>} : memref<16x3xf32, #tpu.memory_space<vmem>>, vector<16x3xf32>,
    return
  }
  func.func @transform_0(%arg0: i32) -> (i32, i32) {
    %c0_i32 = arith.constant 0 : i32
    %c0_i32_0 = arith.constant 0 : i32
    return %arg0, %c0_i32 : i32, i32
  }
  func.func @transform_1(%arg0: i32) -> (i32, i32) {
    %c0_i32 = arith.constant 0 : i32
    %c0_i32_0 = arith.constant 0 : i32
    %c0_i32_1 = arith.constant 0 : i32
    return %c0_i32, %c0_i32_0 : i32, i32
  }
  func.func @transform_2(%arg0: i32) -> (i32, i32) {
    %c0_i32 = arith.constant 0 : i32
    %c0_i32_0 = arith.constant 0 : i32
    %c0_i32_1 = arith.constant 0 : i32
    return %c0_i32, %c0_i32_0 : i32, i32
  }
  func.func @transform_3(%arg0: i32) -> (i32, i32) {
    %c0_i32 = arith.constant 0 : i32
    %c0_i32_0 = arith.constant 0 : i32
    %c0_i32_1 = arith.constant 0 : i32
    return %c0_i32, %c0_i32_0 : i32, i32
  }
  func.func @transform_4(%arg0: i32) -> (i32, i32) {
    %c0_i32 = arith.constant 0 : i32
    %c0_i32_0 = arith.constant 0 : i32
    %c0_i32_1 = arith.constant 0 : i32
    return %c0_i32, %c0_i32_0 : i32, i32
  }
  func.func @transform_5(%arg0: i32) -> (i32, i32) {
    %c0_i32 = arith.constant 0 : i32
    %c0_i32_0 = arith.constant 0 : i32
    return %arg0, %c0_i32 : i32, i32
  }
}

</mosaic_0001>

<bundles_post_ra>
// kernel: tpu_custom_call.1
= control target key start
LH: loop header
LB: loop body
LE: loop exit
PB: predicated region body
PF: predicated region fallthrough
CT: control target
= control target key end

     0   :  { %vm33_vm0 = vcmask 261120   ;;  %vm133_vm1 = vcmask 64512   ;;  %vm215_vm2 = vcmask 23552   ;;  %s328_s1 = inlined_call_operand.vmem [shape: f32[32,8], index: 1, kind: input, shape index: {}]   ;;  %s329_s0 = inlined_call_operand.vmem [shape: f32[16,32], index: 0, kind: input, shape index: {}]   ;;  %s330_s3 = inlined_call_operand.vmem [shape: f32[8,3], index: 3, kind: input, shape index: {}]   ;;  %s331_s2 = inlined_call_operand.vmem [shape: f32[1,8], index: 2, kind: input, shape index: {}]   ;;  %s332_s4 = inlined_call_operand.vmem [shape: f32[1,3], index: 4, kind: input, shape index: {}]   ;;  %s333_s5 = inlined_call_operand.vmem [shape: f32[16,3], index: 5, kind: output, shape index: {}]  }
   0x1   :  { %v22_v0 = vld [vmem:[%s328_s1] sm:$0xff]  ;;  %v23_v1 = vld [vmem:[%s328_s1 + $0x8] sm:$0xff]  ;;  %v24_v2 = vld [vmem:[%s328_s1 + $0x10] sm:$0xff] }
   0x2   :  { %v253_v3 = vpack.c.bf16 %v23_v1, %v22_v0  ;;  %v25_v4 = vld [vmem:[%s328_s1 + $0x18] sm:$0xff]  ;;  %v20_v5 = vld [vmem:[%s329_s0] sm:$0xff]  ;;  %v21_v7 = vld [vmem:[%s329_s0 + $0x8] sm:$0xff] }
   0x3   :  { %v257_v6 = vpack.c.bf16 %v25_v4, %v24_v2  ;;  %245 = vmatprep.mubr.msk.f32.mxu0 %vm33_vm0, %v20_v5  ;;  %v125_v8 = vld [vmem:[%s330_s3] sm:$0xff] }
   0x4   :  { %254 = vmatprep.subr.bf16.mxu0 %v253_v3  ;;  %248 = vmatprep.subr.mxu1 %v125_v8  ;;  %v222_v9 = vld [vmem:[%s331_s2] ss:$0 sm:$0xff] }
   0x5   :  { %256 = vmatpush3.bf16.msra.mxu0 %v253_v3  ;;  %249 = vmatpush3.msra.mxu1 %v125_v8  ;;  %v225_v24 = vld [vmem:[%s332_s4] ss:$0 sm:$0xff] }
   0x6   :  { %258 = vmatprep.subr.bf16.mxu0 %v257_v6 }
   0x9   :  { %260 = vmatpush3.bf16.msra.mxu0 %v257_v6 }
   0xc   :  { %246 = vmatmul.mubr.msk.f32.vlgmr.msra.gmra.mrb[0].mxu0 %vm33_vm0, %v21_v7 }
  0xdf   :  { %v247_v10 = vpop.f32.mrb[0].mxu0 }
  0xe0   :  { %v112_v11 = vadd.f32 %v247_v10, %v222_v9  ;;  %v106_v12 = vpop.f32.mrb[1].mxu0 }
  0xe1   :  { %v107_v13 = vadd.f32 %v222_v9, %v106_v12 }
  0xe2   :  { %v118_v14 = vmul.f32 0.70710677, %v112_v11  ;;  %v116_v21 = vmul.f32 0.5, %v112_v11 }
  0xe3   :  { %v117_v15 = vmul.f32 0.70710677, %v107_v13  ;;  %v115_v19 = vmul.f32 0.5, %v107_v13 }
  0xe4   :  { %261 = verf.f32 %v118_v14 }
  0xe5   :  { %263 = verf.f32 %v117_v15 }
  0xee   :  { %v262_v16 = vpop.eup %261 }
  0xef   :  { %v264_v17 = vpop.eup %263  ;;  %v122_v18 = vadd.f32 1.0, %v262_v16 }
  0xf0   :  { %v121_v20 = vadd.f32 1.0, %v264_v17 }
  0xf1   :  { %v124_v23 = vmul.f32 %v122_v18, %v116_v21 }
  0xf2   :  { %v123_v22 = vmul.f32 %v121_v20, %v115_v19 }
  0xf4   :  { %250 = vmatprep.mubr.msk.f32.mxu1 %vm133_vm1, %v123_v22 }
  0xf5   :  { %251 = vmatmul.mubr.msk.f32.vlgmr.msra.gmra.mrb[0].mxu1 %vm133_vm1, %v124_v23 }
 0x1c8   :  { %v252_v25 = vpop.f32.mrb[0].mxu1 }
 0x1c9   :  { %v212_v26 = vadd.f32 %v252_v25, %v225_v24  ;;  %v206_v27 = vpop.f32.mrb[1].mxu1 }
 0x1ca   :  { %v207_v28 = vadd.f32 %v225_v24, %v206_v27 }
 0x1cb   :  { %217 = vst.msk [vmem:[%s333_s5 + $0x8] sm:$0xff] %vm215_vm2, %v212_v26 }
 0x1cc   :  { %216 = vst.msk [vmem:[%s333_s5] sm:$0xff] %vm215_vm2, %v207_v28 }

</bundles_post_ra>
